<compile_context>
chip_gen: v7x
topology: tpu7x:2x2x1
jax: 0.10.0
libtpu: 0.0.40
codegen_flags: <defaults>
</compile_context>

<pallas_src>
import functools

import jax
import jax.numpy as jnp
from jax.experimental import pallas as pl
from jax.experimental.pallas import tpu as pltpu

# Deterministic "config" (would come from config['loss'] in PyTorch).
LOSS_WEIGHT = 2.0          # config['loss']['weight']
INVALID_WEIGHT = 0.5       # config['loss']['invalid_weight']
POS_WEIGHT = 100.0         # hard-coded in the module's forward

_LANES = 128
_TM_MAX = 4096             # rows per grid step (tile = tm x 128; 2 MiB f32 at 4096)
_N_PAR = 2                 # leading "parallel" grid axis (v7x dual TensorCore)
# TODO(synk): on v7x, if the profile shows one idle TensorCore, switch this axis to
# pltpu.CORE_PARALLEL (or pl.core_map) — plain "parallel" is kept for portability.


def _wbce_kernel(x_ref, t_ref, out_ref, acc_ref, *, tm, steps, n_blocks, n_elem,
                 needs_elem_mask, has_dup_blocks, weight, invalid_weight,
                 pos_weight):
    c = pl.program_id(0)            # parallel (core) axis
    s = pl.program_id(1)            # sequential reduction axis

    @pl.when(s == 0)
    def _():
        acc_ref[...] = jnp.zeros_like(acc_ref)

    x = x_ref[...].astype(jnp.float32)
    t = t_ref[...].astype(jnp.float32)

    # Per-element weight: `weight` where target > 0, else `invalid_weight`.
    w = jnp.where(t > 0.0, weight, invalid_weight)

    # Numerically stable BCE-with-logits with pos_weight (PyTorch semantics):
    #   le = (1 - t) * x + (1 + (pos_weight - 1) * t) * softplus(-x)
    softplus_neg_x = jnp.maximum(-x, 0.0) + jnp.log1p(jnp.exp(-jnp.abs(x)))
    le = (1.0 - t) * x + (1.0 + (pos_weight - 1.0) * t) * softplus_neg_x
    contrib = w * le

    def fold(v):
        # (tm, 128) -> (8, 128): reshape is tile-aligned (free), sum is a VALU chain.
        return v.reshape(tm // 8, 8, _LANES).sum(axis=0)

    gblk = c * steps + s            # global block index

    if not (needs_elem_mask or has_dup_blocks):
        # Fast path: every block is full and real — no gating whatsoever.
        acc_ref[...] += fold(contrib)
    else:
        plain_upto = n_blocks - 1 if needs_elem_mask else n_blocks

        @pl.when(gblk < plain_upto)
        def _():
            acc_ref[...] += fold(contrib)

        if needs_elem_mask:
            @pl.when(gblk == n_blocks - 1)
            def _():
                # Mask everything past the real element count (ragged rows of the
                # partial last block and/or zero-padded tail elements).
                row = jax.lax.broadcasted_iota(jnp.int32, contrib.shape, 0)
                col = jax.lax.broadcasted_iota(jnp.int32, contrib.shape, 1)
                gidx = gblk * (tm * _LANES) + row * _LANES + col
                acc_ref[...] += fold(jnp.where(gidx < n_elem, contrib, 0.0))
        # gblk >= n_blocks: clamped duplicate block -> contribute nothing.

    @pl.when(s == pl.num_programs(1) - 1)
    def _():
        out_ref[...] = acc_ref[...]


def weighted_bce_with_logits_loss(logits, target, *, weight=LOSS_WEIGHT,
                                  invalid_weight=INVALID_WEIGHT,
                                  pos_weight=POS_WEIGHT, tm_max=_TM_MAX):
    """Mean weighted BCE-with-logits loss (scalar, float32)."""
    n_elem = logits.size

    # Flatten in native storage dtype (f32 cast happens inside the kernel).
    x = logits.reshape(-1)
    t = target.reshape(-1)

    # Lane-dense layout. Common case (n_elem multiple of 128, >= 8 rows): the
    # reshape is a free bitcast and NO data copy happens. Rare fallback (ragged
    # lane count or tiny input): pad to the next full (>=8)-row slab — one copy.
    arr_rows = max(8, pl.cdiv(n_elem, _LANES))
    padded_elems = arr_rows * _LANES
    if padded_elems != n_elem:
        pad = padded_elems - n_elem
        x = jnp.pad(x, (0, pad))
        t = jnp.pad(t, (0, pad))
    x2 = x.reshape(arr_rows, _LANES)
    t2 = t.reshape(arr_rows, _LANES)

    # Tile rows: multiple of 8, never larger than the array (so only the *last*
    # grid block can be partial, which the kernel masks in place).
    tm = min(tm_max, (arr_rows // 8) * 8)
    n_blocks = pl.cdiv(arr_rows, tm)

    n_par = _N_PAR if n_blocks >= _N_PAR else 1
    steps = pl.cdiv(n_blocks, n_par)

    needs_elem_mask = (n_blocks * tm * _LANES != n_elem)
    has_dup_blocks = (n_par * steps != n_blocks)

    kernel = functools.partial(
        _wbce_kernel, tm=tm, steps=steps, n_blocks=n_blocks, n_elem=n_elem,
        needs_elem_mask=needs_elem_mask, has_dup_blocks=has_dup_blocks,
        weight=float(weight), invalid_weight=float(invalid_weight),
        pos_weight=float(pos_weight))

    # Clamp block index so the duplicate trailing step (if any) re-reads a valid
    # block instead of DMA'ing past the array; the kernel skips its contribution.
    def in_map(c, s):
        return (jnp.minimum(c * steps + s, n_blocks - 1), 0)

    out_bytes = n_par * 8 * _LANES * 4
    cost = pl.CostEstimate(
        flops=15 * n_elem,
        transcendentals=2 * n_elem,
        bytes_accessed=int(x2.nbytes) + int(t2.nbytes) + out_bytes)

    partials = pl.pallas_call(
        kernel,
        out_shape=jax.ShapeDtypeStruct((n_par * 8, _LANES), jnp.float32),
        grid_spec=pltpu.PrefetchScalarGridSpec(
            num_scalar_prefetch=0,
            grid=(n_par, steps),
            in_specs=[
                pl.BlockSpec((tm, _LANES), in_map),
                pl.BlockSpec((tm, _LANES), in_map),
            ],
            out_specs=pl.BlockSpec((8, _LANES), lambda c, s: (c, 0)),
            scratch_shapes=[pltpu.VMEM((8, _LANES), jnp.float32)],
        ),
        compiler_params=pltpu.CompilerParams(
            dimension_semantics=("parallel", "arbitrary"),
            vmem_limit_bytes=32 * 1024 * 1024),
        cost_estimate=cost,
    )(x2, t2)

    return jnp.sum(partials) / jnp.float32(n_elem)


def _reference(logits, target, weight, invalid_weight, pos_weight):
    x = logits.astype(jnp.float32)
    t = target.astype(jnp.float32)
    w = jnp.where(t > 0.0, weight, invalid_weight)
    sp = jnp.maximum(-x, 0.0) + jnp.log1p(jnp.exp(-jnp.abs(x)))
    le = (1.0 - t) * x + (1.0 + (pos_weight - 1.0) * t) * sp
    return jnp.mean(w * le)


if __name__ == "__main__":
    key = jax.random.PRNGKey(0)
    k1, k2, k3, k4, k5, k6 = jax.random.split(key, 6)

    # Main check: (B, C, H, W) = (2, 4, 16, 16) -> 2048 elems, exact fast path.
    B, C, H, W = 2, 4, 16, 16
    logits = jax.random.normal(k1, (B, C, H, W), dtype=jnp.float32)
    target = (jax.random.uniform(k2, (B, C, H, W)) > 0.5).astype(jnp.float32)
    loss = jax.block_until_ready(weighted_bce_with_logits_loss(logits, target))
    ref = _reference(logits, target, LOSS_WEIGHT, INVALID_WEIGHT, POS_WEIGHT)
    assert jnp.allclose(loss, ref, rtol=1e-5, atol=1e-5), (loss, ref)

    # Ragged check: element count not a multiple of 128 (exercises the tail mask).
    logits2 = jax.random.normal(k3, (2, 3, 17, 19), dtype=jnp.float32)
    target2 = (jax.random.uniform(k4, (2, 3, 17, 19)) > 0.5).astype(jnp.float32)
    loss2 = jax.block_until_ready(weighted_bce_with_logits_loss(logits2, target2))
    ref2 = _reference(logits2, target2, LOSS_WEIGHT, INVALID_WEIGHT, POS_WEIGHT)
    assert jnp.allclose(loss2, ref2, rtol=1e-5, atol=1e-5), (loss2, ref2)

    # Multi-block / parallel-axis check with an odd block count (exercises the
    # clamped duplicate-block skip) using a small tile for test purposes.
    logits3 = jax.random.normal(k5, (2, 4, 16, 24), dtype=jnp.float32)
    target3 = (jax.random.uniform(k6, (2, 4, 16, 24)) > 0.5).astype(jnp.float32)
    loss3 = jax.block_until_ready(
        weighted_bce_with_logits_loss(logits3, target3, tm_max=8))
    ref3 = _reference(logits3, target3, LOSS_WEIGHT, INVALID_WEIGHT, POS_WEIGHT)
    assert jnp.allclose(loss3, ref3, rtol=1e-5, atol=1e-5), (loss3, ref3)

    print("KERNEL_OK")
</pallas_src>

<mosaic_0001>
module attributes {stable_mosaic.version = 11 : i64} {
  func.func @_wbce_kernel(%arg0: i32, %arg1: i32, %arg2: memref<16x128xf32, #tpu.memory_space<vmem>>, %arg3: memref<16x128xf32, #tpu.memory_space<vmem>>, %arg4: memref<8x128xf32, #tpu.memory_space<vmem>>, %arg5: memref<8x128xf32, #tpu.memory_space<vmem>>) attributes {dimension_semantics = [#tpu.dimension_semantics<parallel>, #tpu.dimension_semantics<arbitrary>], iteration_bounds = array<i64: 1, 1>, scalar_prefetch = 0 : i64, scratch_operands = 1 : i64, tpu.core_type = #tpu.core_type<tc>, window_params = [{transform_indices = @transform_0, window_bounds = array<i64: 16, 128>}, {transform_indices = @transform_1, window_bounds = array<i64: 16, 128>}, {transform_indices = @transform_2, window_bounds = array<i64: 8, 128>}]} {
    %c0_i32 = arith.constant 0 : i32
    %0 = arith.cmpi eq, %arg1, %c0_i32 : i32
    %1 = arith.extui %0 : i1 to i32
    %c0_i32_0 = arith.constant 0 : i32
    %2 = arith.cmpi ne, %1, %c0_i32_0 : i32
    scf.if %2 {
      %cst_19 = arith.constant 0.000000e+00 : f32
      %38 = vector.broadcast %cst_19 : f32 to vector<8x128xf32>
      %c0_20 = arith.constant 0 : index
      %c0_21 = arith.constant 0 : index
      %39 = vector.load %arg5[%c0_20, %c0_21] : memref<8x128xf32, #tpu.memory_space<vmem>>, vector<8x128xf32>
      tpu.vector_store %arg5[%c0_20, %c0_21], %38 {strides = array<i32>} : memref<8x128xf32, #tpu.memory_space<vmem>>, vector<8x128xf32>,
    } else {
    }
    %c0 = arith.constant 0 : index
    %c0_1 = arith.constant 0 : index
    %3 = vector.load %arg2[%c0, %c0_1] : memref<16x128xf32, #tpu.memory_space<vmem>>, vector<16x128xf32>
    %c0_2 = arith.constant 0 : index
    %c0_3 = arith.constant 0 : index
    %4 = vector.load %arg3[%c0_2, %c0_3] : memref<16x128xf32, #tpu.memory_space<vmem>>, vector<16x128xf32>
    %cst = arith.constant 0.000000e+00 : f32
    %5 = vector.broadcast %cst : f32 to vector<16x128xf32>
    %6 = arith.cmpf ogt, %4, %5 : vector<16x128xf32>
    %cst_4 = arith.constant 2.000000e+00 : f32
    %cst_5 = arith.constant 5.000000e-01 : f32
    %7 = vector.broadcast %cst_4 : f32 to vector<16x128xf32>
    %8 = vector.broadcast %cst_5 : f32 to vector<16x128xf32>
    %9 = arith.select %6, %7, %8 : vector<16x128xi1>, vector<16x128xf32>
    %cst_6 = arith.constant 0.000000e+00 : f32
    %10 = vector.broadcast %cst_6 : f32 to vector<16x128xf32>
    %11 = arith.subf %10, %3 : vector<16x128xf32>
    %cst_7 = arith.constant 0.000000e+00 : f32
    %12 = vector.broadcast %cst_7 : f32 to vector<16x128xf32>
    %13 = arith.maximumf %11, %12 : vector<16x128xf32>
    %14 = math.absf %3 : vector<16x128xf32>
    %cst_8 = arith.constant 0.000000e+00 : f32
    %15 = vector.broadcast %cst_8 : f32 to vector<16x128xf32>
    %16 = arith.subf %15, %14 : vector<16x128xf32>
    %17 = math.exp %16 : vector<16x128xf32>
    %18 = math.log1p %17 : vector<16x128xf32>
    %19 = arith.addf %13, %18 : vector<16x128xf32>
    %cst_9 = arith.constant 1.000000e+00 : f32
    %20 = vector.broadcast %cst_9 : f32 to vector<16x128xf32>
    %21 = arith.subf %20, %4 : vector<16x128xf32>
    %22 = arith.mulf %21, %3 : vector<16x128xf32>
    %cst_10 = arith.constant 9.900000e+01 : f32
    %23 = vector.broadcast %cst_10 : f32 to vector<16x128xf32>
    %24 = arith.mulf %23, %4 : vector<16x128xf32>
    %cst_11 = arith.constant 1.000000e+00 : f32
    %25 = vector.broadcast %cst_11 : f32 to vector<16x128xf32>
    %26 = arith.addf %25, %24 : vector<16x128xf32>
    %27 = arith.mulf %26, %19 : vector<16x128xf32>
    %28 = arith.addf %22, %27 : vector<16x128xf32>
    %29 = arith.mulf %9, %28 : vector<16x128xf32>
    %c0_12 = arith.constant 0 : index
    %c0_13 = arith.constant 0 : index
    %30 = vector.load %arg5[%c0_12, %c0_13] : memref<8x128xf32, #tpu.memory_space<vmem>>, vector<8x128xf32>
    %31 = vector.shape_cast %29 : vector<16x128xf32> to vector<2x8x128xf32>
    %cst_14 = arith.constant dense<0.000000e+00> : vector<8x128xf32>
    %32 = vector.multi_reduction <add>, %31, %cst_14 [0] : vector<2x8x128xf32> to vector<8x128xf32>
    %33 = arith.addf %30, %32 : vector<8x128xf32>
    %c0_15 = arith.constant 0 : index
    %c0_16 = arith.constant 0 : index
    %34 = vector.load %arg5[%c0_15, %c0_16] : memref<8x128xf32, #tpu.memory_space<vmem>>, vector<8x128xf32>
    tpu.vector_store %arg5[%c0_15, %c0_16], %33 {strides = array<i32>} : memref<8x128xf32, #tpu.memory_space<vmem>>, vector<8x128xf32>,
    %c0_i32_17 = arith.constant 0 : i32
    %35 = arith.cmpi eq, %arg1, %c0_i32_17 : i32
    %36 = arith.extui %35 : i1 to i32
    %c0_i32_18 = arith.constant 0 : i32
    %37 = arith.cmpi ne, %36, %c0_i32_18 : i32
    scf.if %37 {
      %c0_19 = arith.constant 0 : index
      %c0_20 = arith.constant 0 : index
      %38 = vector.load %arg5[%c0_19, %c0_20] : memref<8x128xf32, #tpu.memory_space<vmem>>, vector<8x128xf32>
      %c0_21 = arith.constant 0 : index
      %c0_22 = arith.constant 0 : index
      %39 = vector.load %arg4[%c0_21, %c0_22] : memref<8x128xf32, #tpu.memory_space<vmem>>, vector<8x128xf32>
      tpu.vector_store %arg4[%c0_21, %c0_22], %38 {strides = array<i32>} : memref<8x128xf32, #tpu.memory_space<vmem>>, vector<8x128xf32>,
    } else {
    }
    return
  }
  func.func @transform_0(%arg0: i32, %arg1: i32) -> (i32, i32) {
    %c1_i32 = arith.constant 1 : i32
    %0 = arith.muli %arg0, %c1_i32 : i32
    %1 = arith.addi %0, %arg1 : i32
    %c0_i32 = arith.constant 0 : i32
    %2 = arith.minsi %1, %c0_i32 : i32
    %c0_i32_0 = arith.constant 0 : i32
    %c0_i32_1 = arith.constant 0 : i32
    return %2, %c0_i32_0 : i32, i32
  }
  func.func @transform_1(%arg0: i32, %arg1: i32) -> (i32, i32) {
    %c1_i32 = arith.constant 1 : i32
    %0 = arith.muli %arg0, %c1_i32 : i32
    %1 = arith.addi %0, %arg1 : i32
    %c0_i32 = arith.constant 0 : i32
    %2 = arith.minsi %1, %c0_i32 : i32
    %c0_i32_0 = arith.constant 0 : i32
    %c0_i32_1 = arith.constant 0 : i32
    return %2, %c0_i32_0 : i32, i32
  }
  func.func @transform_2(%arg0: i32, %arg1: i32) -> (i32, i32) {
    %c0_i32 = arith.constant 0 : i32
    %c0_i32_0 = arith.constant 0 : i32
    return %arg0, %c0_i32 : i32, i32
  }
}

</mosaic_0001>

<bundles_post_ra>
// kernel: tpu_custom_call.1
= control target key start
LH: loop header
LB: loop body
LE: loop exit
PB: predicated region body
PF: predicated region fallthrough
CT: control target
= control target key end

     0   :  { %7 = vsyncpa [#allocation4], 0  ;;  %s291_s0 = inlined_call_operand.hbm [shape: f32[16,128], index: 0, kind: input, shape index: {}]   ;;  %s292_s1 = inlined_call_operand.hbm [shape: f32[16,128], index: 1, kind: input, shape index: {}]   ;;  %s293_s2 = inlined_call_operand.hbm [shape: f32[8,128], index: 2, kind: output, shape index: {}]  }
   0x1   :  { %8 = vsyncpa [#allocation7], 0 }
   0x2   :  { %9 = vsyncpa [#allocation5], 0  ;;  %s234_s9 = smov [#allocation3]   ;;  %s162_s13 = scalar_lea.hbm %s291_s0, 256 }
   0x3   :  { %s21_s10 = sshll.u32 %s234_s9, 4  ;;  %p163_p0 = scmp.ne.s32.totalorder %s291_s0, %s162_s13  ;;  %s22_s10 = int_to_ptr.vmem [resolvable:$true] %s21_s10 }
   0x4   :  { %p166_p1 = scmp.lt.u32.totalorder %s162_s13, %s291_s0 }
   0x6   :  { %p168_p2 = pnand %p166_p1, %p163_p0 }
   0x8   :  { %171 = shalt.err (!%p168_p2)
}
   0x9   :  { %s172_s18 = scalar_lea.vmem %s22_s10, 256  ;;  %p177_p4 = scmp.lt.s32.totalorder %s22_s10, %s22_s10 }
   0xa   :  { %p173_p3 = scmp.ne.s32.totalorder %s22_s10, %s172_s18  ;;  %p178_p5 = scmp.lt.s32.totalorder %s172_s18, %s172_s18 }
   0xc   :  { %p179_p6 = por %p178_p5, %p177_p4 }
   0xe   :  { %p180_p7 = pnand %p179_p6, %p173_p3 }
  0x10   :  { %183 = shalt.err (!%p180_p7)
}
  0x11   :  { %s235_s19 = smov 128   ;;  %s236_s20 = smov 8  }
  0x12   :  { %27 = dma.hbm_to_vmem [thread:$0]  %s291_s0, 256, %s22_s10, [#allocation4], %s235_s19, %s235_s19, %s236_s20  }
  0x13   :  { %s237_s23 = smov [#allocation6]   ;;  %s184_s27 = scalar_lea.hbm %s292_s1, 256 }
  0x14   :  { %s39_s24 = sshll.u32 %s237_s23, 4  ;;  %p185_p8 = scmp.ne.s32.totalorder %s292_s1, %s184_s27  ;;  %s40_s24 = int_to_ptr.vmem [resolvable:$true] %s39_s24 }
  0x15   :  { %p188_p9 = scmp.lt.u32.totalorder %s184_s27, %s292_s1 }
  0x17   :  { %p190_p10 = pnand %p188_p9, %p185_p8 }
  0x19   :  { %193 = shalt.err (!%p190_p10)
}
  0x1a   :  { %s194_s4 = scalar_lea.vmem %s40_s24, 256  ;;  %p199_p12 = scmp.lt.s32.totalorder %s40_s24, %s40_s24 }
  0x1b   :  { %p195_p11 = scmp.ne.s32.totalorder %s40_s24, %s194_s4  ;;  %p200_p13 = scmp.lt.s32.totalorder %s194_s4, %s194_s4 }
  0x1d   :  { %p201_p0 = por %p200_p13, %p199_p12 }
  0x1f   :  { %p202_p1 = pnand %p201_p0, %p195_p11 }
  0x21   :  { %205 = shalt.err (!%p202_p1)
}
  0x22   :  { %45 = dma.hbm_to_vmem [thread:$0]  %s292_s1, 256, %s40_s24, [#allocation7], %s235_s19, %s235_s19, %s236_s20  }
  0x23   :  { %228 = dma.done.wait [#allocation4], 256  }
  0x24   :  { %229 = vsyncadd [#allocation4], 4294967040 }
  0x25   :  { %230 = dma.done.wait [#allocation7], 256  }
  0x26   :  { %231 = vsyncadd [#allocation7], 4294967040  ;;  %v65_v0 = vld [vmem:[#allocation3] sm:$0xff]  ;;  %v66_v1 = vld [vmem:[#allocation3 + $0x8] sm:$0xff]  ;;  %v238_v43 = vmov 0.5   ;;  %s239_s1 = smov [#allocation8]  }
  0x27   :  { %v77_v2 = vand.u32 2147483647, %v65_v0  ;;  %v78_v3 = vand.u32 2147483647, %v66_v1  ;;  %v67_v14 = vld [vmem:[#allocation6] sm:$0xff]  ;;  %v68_v16 = vld [vmem:[#allocation6 + $0x8] sm:$0xff] }
  0x28   :  { %v73_v17 = vsub.f32 0.0, %v65_v0  ;;  %v74_v20 = vsub.f32 0.0, %v66_v1  ;;  %v109_v22 = vmul.f32 99.0, %v67_v14  ;;  %v110_v24 = vmul.f32 99.0, %v68_v16  ;;  %s134_s6 = sshll.u32 %s239_s1, 4  ;;  %s135_s6 = int_to_ptr.vmem [resolvable:$true] %s134_s6 }
  0x29   :  { %v79_v4 = vsub.f32 0.0, %v77_v2  ;;  %v80_v5 = vsub.f32 0.0, %v78_v3  ;;  %v105_v28 = vsub.f32 1.0, %v67_v14  ;;  %v106_v32 = vsub.f32 1.0, %v68_v16  ;;  %s206_s7 = scalar_lea.vmem %s135_s6, 128  ;;  %p211_p3 = scmp.lt.s32.totalorder %s135_s6, %s135_s6 }
  0x2a   :  { %v75_v26 = vmax.f32 %v73_v17, 0.0  ;;  %v76_v30 = vmax.f32 %v74_v20, 0.0  ;;  %v111_v34 = vadd.f32 1.0, %v109_v22  ;;  %v112_v36 = vadd.f32 1.0, %v110_v24  ;;  %p207_p2 = scmp.ne.s32.totalorder %s135_s6, %s206_s7  ;;  %p212_p4 = scmp.lt.s32.totalorder %s206_s7, %s206_s7 }
  0x2b   :  { %v81_v6 = vmul.f32 1.442695, %v79_v4  ;;  %v83_v7 = vmul.f32 1.442695, %v80_v5  ;;  %vm69_vm2 = vcmp.gt.f32.partialorder %v67_v14, 0.0  ;;  %v107_v39 = vmul.f32 %v105_v28, %v65_v0 }
  0x2c   :  { %vm70_vm3 = vcmp.gt.f32.partialorder %v68_v16, 0.0  ;;  %v108_v41 = vmul.f32 %v106_v32, %v66_v1  ;;  %v71_v44 = vsel %vm69_vm2, 2.0, %v238_v43  ;;  %p213_p5 = por %p212_p4, %p211_p3 }
  0x2d   :  { %154 = vpow2.f32 %v81_v6  ;;  %v72_v46 = vsel %vm70_vm3, 2.0, %v238_v43 }
  0x2e   :  { %156 = vpow2.f32 %v83_v7  ;;  %p214_p6 = pnand %p213_p5, %p207_p2 }
  0x37   :  { %v155_v8 = vpop.eup %154 }
  0x38   :  { %v157_v9 = vpop.eup %156  ;;  %v85_v10 = vadd.f32 1.0, %v155_v8  ;;  %v88_v12 = vmul.f32 -0.5, %v155_v8  ;;  %v91_v18 = vand.u32 2147483647, %v155_v8 }
  0x39   :  { %v94_v11 = vadd.f32 1.0, %v157_v9  ;;  %v97_v13 = vmul.f32 -0.5, %v157_v9  ;;  %v100_v21 = vand.u32 2147483647, %v157_v9 }
  0x3a   :  { %158 = vlog2.f32 %v85_v10  ;;  %v89_v15 = vadd.f32 1.0, %v88_v12  ;;  %vm92_vm0 = vcmp.lt.f32.partialorder %v91_v18, 0.0004427343 }
  0x3b   :  { %160 = vlog2.f32 %v94_v11  ;;  %v98_v19 = vadd.f32 1.0, %v97_v13  ;;  %vm101_vm1 = vcmp.lt.f32.partialorder %v100_v21, 0.0004427343 }
  0x3c   :  { %v90_v23 = vmul.f32 %v155_v8, %v89_v15 }
  0x3d   :  { %v99_v27 = vmul.f32 %v157_v9, %v98_v19 }
  0x44   :  { %v159_v25 = vpop.eup %158 }
  0x45   :  { %v161_v29 = vpop.eup %160  ;;  %v87_v31 = vmul.f32 0.6931472, %v159_v25 }
  0x46   :  { %v96_v33 = vmul.f32 0.6931472, %v161_v29 }
  0x47   :  { %v93_v35 = vsel %vm92_vm0, %v90_v23, %v87_v31 }
  0x48   :  { %v102_v37 = vsel %vm101_vm1, %v99_v27, %v96_v33  ;;  %v103_v38 = vadd.f32 %v93_v35, %v75_v26 }
  0x49   :  { %v104_v40 = vadd.f32 %v102_v37, %v76_v30 }
  0x4a   :  { %v113_v42 = vmul.f32 %v111_v34, %v103_v38 }
  0x4b   :  { %v114_v45 = vmul.f32 %v112_v36, %v104_v40 }
  0x4c   :  { %v115_v47 = vadd.f32 %v113_v42, %v107_v39 }
  0x4d   :  { %v116_v48 = vadd.f32 %v114_v45, %v108_v41 }
  0x4e   :  { %v117_v49 = vmul.f32 %v115_v47, %v71_v44 }
  0x4f   :  { %v118_v50 = vmul.f32 %v116_v48, %v72_v46 }
  0x51   :  { %v120_v51 = vadd.f32 %v118_v50, %v117_v49 }
  0x53   :  { %127 = vst [vmem:[#allocation8] sm:$0xff] %v120_v51 }
  0x54   :  { %217 = shalt.err (!%p214_p6)
}
  0x55   :  { %s218_s10 = scalar_lea.hbm %s293_s2, 128 }
  0x56   :  { %p219_p7 = scmp.ne.s32.totalorder %s293_s2, %s218_s10  ;;  %p222_p8 = scmp.lt.u32.totalorder %s218_s10, %s293_s2 }
  0x58   :  { %p224_p9 = pnand %p222_p8, %p219_p7 }
  0x5a   :  { %227 = shalt.err (!%p224_p9)
}
  0x5b   :  { %137 = dma.vmem_to_hbm [thread:$0]  %s135_s6, 128, %s293_s2, [#allocation5]  }
  0x5c   :  { %232 = dma.done.wait [#allocation5], 128  }
  0x5d   :  { %233 = vsyncadd [#allocation5], 4294967168 }
  0x5e   :  { %141 = vsyncpa [#allocation4], 1 }
  0x5f   :  { %142 = vsyncpa [#allocation7], 1 }
  0x60   :  { %143 = vsyncpa [#allocation5], 1 }

</bundles_post_ra>
